<compile_context>
chip_gen: v7x
topology: tpu7x:2x2x1
jax: 0.10.0
libtpu: 0.0.40
codegen_flags: <defaults>
</compile_context>

<pallas_src>
import jax
import jax.numpy as jnp
from jax.experimental import pallas as pl
from jax.experimental.pallas import tpu as pltpu

LANES = 128
TM_MAX = 1024  # rows per block; 2 inputs x 2 buffers x 512 KiB = 2 MiB (f32)


def _dice_kernel(smooth):
    def kernel(pred_ref, tgt_ref, out_ref, inter_acc, union_acc):
        i = pl.program_id(0)

        @pl.when(i == 0)
        def _init():
            inter_acc[...] = jnp.zeros_like(inter_acc)
            union_acc[...] = jnp.zeros_like(union_acc)

        # Cast in-kernel (inputs stay in their native dtype in HBM).
        p = pred_ref[...].astype(jnp.float32)
        t = tgt_ref[...].astype(jnp.float32)

        # Lane-dense accumulation: pure VPU adds, hidden under the input DMA.
        inter_acc[...] += p * t
        union_acc[...] += p + t

        @pl.when(i == pl.num_programs(0) - 1)
        def _finalize():
            # Single full reduction at the very end.
            intersection = jnp.sum(inter_acc[...], keepdims=True)  # (1, 1)
            union = jnp.sum(union_acc[...], keepdims=True)         # (1, 1)
            dice = (2.0 * intersection + smooth) / (union + smooth)
            out_ref[...] = 1.0 - dice

    return kernel


def dice_loss(pred, target, smooth=1e-6):
    assert pred.shape == target.shape
    n = pred.size

    # Flatten in place (bitcast-style reshape, no copy).
    p_flat = pred.reshape(-1)
    t_flat = target.reshape(-1)

    # Pick the row-tile: big (TM_MAX) for large inputs, single-block for small.
    m_needed = pl.cdiv(n, LANES)
    if m_needed <= TM_MAX:
        tm = max(8, ((m_needed + 7) // 8) * 8)  # multiple of 8 sublanes
    else:
        tm = TM_MAX
    chunk = tm * LANES
    n_pad = pl.cdiv(n, chunk) * chunk

    if n_pad != n:
        # Only pads when the flat length is not already chunk-aligned; the
        # zero pad contributes nothing to any of the three sums.
        p_flat = jnp.pad(p_flat, (0, n_pad - n))
        t_flat = jnp.pad(t_flat, (0, n_pad - n))

    m = n_pad // LANES
    p2 = p_flat.reshape(m, LANES)
    t2 = t_flat.reshape(m, LANES)
    grid = m // tm

    out = pl.pallas_call(
        _dice_kernel(smooth),
        out_shape=jax.ShapeDtypeStruct((1, 1), jnp.float32),
        grid_spec=pltpu.PrefetchScalarGridSpec(
            num_scalar_prefetch=0,
            grid=(grid,),
            in_specs=[
                pl.BlockSpec((tm, LANES), lambda i: (i, 0)),
                pl.BlockSpec((tm, LANES), lambda i: (i, 0)),
            ],
            out_specs=pl.BlockSpec((1, 1), lambda i: (0, 0)),
            scratch_shapes=[
                pltpu.VMEM((tm, LANES), jnp.float32),
                pltpu.VMEM((tm, LANES), jnp.float32),
            ],
        ),
        compiler_params=pltpu.CompilerParams(
            dimension_semantics=("arbitrary",),
        ),
    )(p2, t2)
    return out[0, 0]


if __name__ == "__main__":
    key = jax.random.PRNGKey(0)
    k1, k2 = jax.random.split(key)
    # NCHW inputs: batch=2, channels=4, spatial=16x16 (matches the module spec).
    pred = jax.nn.sigmoid(jax.random.normal(k1, (2, 4, 16, 16), jnp.float32))
    target = (jax.random.uniform(k2, (2, 4, 16, 16)) > 0.5).astype(jnp.float32)

    loss = dice_loss(pred, target)
    jax.block_until_ready(loss)

    # Reference check (plain JAX, same math as the PyTorch module).
    smooth = 1e-6
    inter = jnp.sum(pred * target)
    union = jnp.sum(pred) + jnp.sum(target)
    ref = 1.0 - (2.0 * inter + smooth) / (union + smooth)
    assert jnp.allclose(loss, ref, atol=1e-5, rtol=1e-5), (loss, ref)

    print("KERNEL_OK")
</pallas_src>

<mosaic_0001>
module attributes {stable_mosaic.version = 11 : i64} {
  func.func @kernel(%arg0: i32, %arg1: memref<16x128xf32, #tpu.memory_space<vmem>>, %arg2: memref<16x128xf32, #tpu.memory_space<vmem>>, %arg3: memref<1x1xf32, #tpu.memory_space<vmem>>, %arg4: memref<16x128xf32, #tpu.memory_space<vmem>>, %arg5: memref<16x128xf32, #tpu.memory_space<vmem>>) attributes {dimension_semantics = [#tpu.dimension_semantics<arbitrary>], iteration_bounds = array<i64: 1>, scalar_prefetch = 0 : i64, scratch_operands = 2 : i64, tpu.core_type = #tpu.core_type<tc>, window_params = [{transform_indices = @transform_0, window_bounds = array<i64: 16, 128>}, {transform_indices = @transform_1, window_bounds = array<i64: 16, 128>}, {pipeline_mode = #tpu.pipeline_mode<synchronous>, transform_indices = @transform_2, window_bounds = array<i64: 1, 1>}]} {
    %c0_i32 = arith.constant 0 : i32
    %0 = arith.cmpi eq, %arg0, %c0_i32 : i32
    %1 = arith.extui %0 : i1 to i32
    %c0_i32_0 = arith.constant 0 : i32
    %2 = arith.cmpi ne, %1, %c0_i32_0 : i32
    scf.if %2 {
      %cst = arith.constant 0.000000e+00 : f32
      %16 = vector.broadcast %cst : f32 to vector<16x128xf32>
      %c0_14 = arith.constant 0 : index
      %c0_15 = arith.constant 0 : index
      %17 = vector.load %arg4[%c0_14, %c0_15] : memref<16x128xf32, #tpu.memory_space<vmem>>, vector<16x128xf32>
      tpu.vector_store %arg4[%c0_14, %c0_15], %16 {strides = array<i32>} : memref<16x128xf32, #tpu.memory_space<vmem>>, vector<16x128xf32>,
      %cst_16 = arith.constant 0.000000e+00 : f32
      %18 = vector.broadcast %cst_16 : f32 to vector<16x128xf32>
      %c0_17 = arith.constant 0 : index
      %c0_18 = arith.constant 0 : index
      %19 = vector.load %arg5[%c0_17, %c0_18] : memref<16x128xf32, #tpu.memory_space<vmem>>, vector<16x128xf32>
      tpu.vector_store %arg5[%c0_17, %c0_18], %18 {strides = array<i32>} : memref<16x128xf32, #tpu.memory_space<vmem>>, vector<16x128xf32>,
    } else {
    }
    %c0 = arith.constant 0 : index
    %c0_1 = arith.constant 0 : index
    %3 = vector.load %arg1[%c0, %c0_1] : memref<16x128xf32, #tpu.memory_space<vmem>>, vector<16x128xf32>
    %c0_2 = arith.constant 0 : index
    %c0_3 = arith.constant 0 : index
    %4 = vector.load %arg2[%c0_2, %c0_3] : memref<16x128xf32, #tpu.memory_space<vmem>>, vector<16x128xf32>
    %c0_4 = arith.constant 0 : index
    %c0_5 = arith.constant 0 : index
    %5 = vector.load %arg4[%c0_4, %c0_5] : memref<16x128xf32, #tpu.memory_space<vmem>>, vector<16x128xf32>
    %6 = arith.mulf %3, %4 : vector<16x128xf32>
    %7 = arith.addf %5, %6 : vector<16x128xf32>
    %c0_6 = arith.constant 0 : index
    %c0_7 = arith.constant 0 : index
    %8 = vector.load %arg4[%c0_6, %c0_7] : memref<16x128xf32, #tpu.memory_space<vmem>>, vector<16x128xf32>
    tpu.vector_store %arg4[%c0_6, %c0_7], %7 {strides = array<i32>} : memref<16x128xf32, #tpu.memory_space<vmem>>, vector<16x128xf32>,
    %c0_8 = arith.constant 0 : index
    %c0_9 = arith.constant 0 : index
    %9 = vector.load %arg5[%c0_8, %c0_9] : memref<16x128xf32, #tpu.memory_space<vmem>>, vector<16x128xf32>
    %10 = arith.addf %3, %4 : vector<16x128xf32>
    %11 = arith.addf %9, %10 : vector<16x128xf32>
    %c0_10 = arith.constant 0 : index
    %c0_11 = arith.constant 0 : index
    %12 = vector.load %arg5[%c0_10, %c0_11] : memref<16x128xf32, #tpu.memory_space<vmem>>, vector<16x128xf32>
    tpu.vector_store %arg5[%c0_10, %c0_11], %11 {strides = array<i32>} : memref<16x128xf32, #tpu.memory_space<vmem>>, vector<16x128xf32>,
    %c0_i32_12 = arith.constant 0 : i32
    %13 = arith.cmpi eq, %arg0, %c0_i32_12 : i32
    %14 = arith.extui %13 : i1 to i32
    %c0_i32_13 = arith.constant 0 : i32
    %15 = arith.cmpi ne, %14, %c0_i32_13 : i32
    scf.if %15 {
      %c0_14 = arith.constant 0 : index
      %c0_15 = arith.constant 0 : index
      %16 = vector.load %arg4[%c0_14, %c0_15] : memref<16x128xf32, #tpu.memory_space<vmem>>, vector<16x128xf32>
      %17 = vector.shape_cast %16 : vector<16x128xf32> to vector<1x16x128xf32>
      %cst = arith.constant dense<0.000000e+00> : vector<1xf32>
      %18 = vector.multi_reduction <add>, %17, %cst [1, 2] : vector<1x16x128xf32> to vector<1xf32>
      %19 = vector.shape_cast %18 : vector<1xf32> to vector<1x1x1xf32>
      %20 = vector.extract %19[0, 0, 0] : f32 from vector<1x1x1xf32>
      %21 = vector.broadcast %20 : f32 to vector<1x1xf32>
      %c0_16 = arith.constant 0 : index
      %c0_17 = arith.constant 0 : index
      %22 = vector.load %arg5[%c0_16, %c0_17] : memref<16x128xf32, #tpu.memory_space<vmem>>, vector<16x128xf32>
      %23 = vector.shape_cast %22 : vector<16x128xf32> to vector<1x16x128xf32>
      %cst_18 = arith.constant dense<0.000000e+00> : vector<1xf32>
      %24 = vector.multi_reduction <add>, %23, %cst_18 [1, 2] : vector<1x16x128xf32> to vector<1xf32>
      %25 = vector.shape_cast %24 : vector<1xf32> to vector<1x1x1xf32>
      %26 = vector.extract %25[0, 0, 0] : f32 from vector<1x1x1xf32>
      %27 = vector.broadcast %26 : f32 to vector<1x1xf32>
      %cst_19 = arith.constant 2.000000e+00 : f32
      %28 = vector.broadcast %cst_19 : f32 to vector<1x1xf32>
      %29 = arith.mulf %28, %21 : vector<1x1xf32>
      %cst_20 = arith.constant 9.99999997E-7 : f32
      %30 = vector.broadcast %cst_20 : f32 to vector<1x1xf32>
      %31 = arith.addf %29, %30 : vector<1x1xf32>
      %cst_21 = arith.constant 9.99999997E-7 : f32
      %32 = vector.broadcast %cst_21 : f32 to vector<1x1xf32>
      %33 = arith.addf %27, %32 : vector<1x1xf32>
      %34 = arith.divf %31, %33 : vector<1x1xf32>
      %cst_22 = arith.constant 1.000000e+00 : f32
      %35 = vector.broadcast %cst_22 : f32 to vector<1x1xf32>
      %36 = arith.subf %35, %34 : vector<1x1xf32>
      %c0_23 = arith.constant 0 : index
      %c0_24 = arith.constant 0 : index
      %37 = vector.load %arg3[%c0_23, %c0_24] : memref<1x1xf32, #tpu.memory_space<vmem>>, vector<1x1xf32>
      tpu.vector_store %arg3[%c0_23, %c0_24], %36 {strides = array<i32>} : memref<1x1xf32, #tpu.memory_space<vmem>>, vector<1x1xf32>,
    } else {
    }
    return
  }
  func.func @transform_0(%arg0: i32) -> (i32, i32) {
    %c0_i32 = arith.constant 0 : i32
    %c0_i32_0 = arith.constant 0 : i32
    return %arg0, %c0_i32 : i32, i32
  }
  func.func @transform_1(%arg0: i32) -> (i32, i32) {
    %c0_i32 = arith.constant 0 : i32
    %c0_i32_0 = arith.constant 0 : i32
    return %arg0, %c0_i32 : i32, i32
  }
  func.func @transform_2(%arg0: i32) -> (i32, i32) {
    %c0_i32 = arith.constant 0 : i32
    %c0_i32_0 = arith.constant 0 : i32
    %c0_i32_1 = arith.constant 0 : i32
    return %c0_i32, %c0_i32_0 : i32, i32
  }
}

</mosaic_0001>

<bundles_post_ra>
// kernel: tpu_custom_call.1
= control target key start
LH: loop header
LB: loop body
LE: loop exit
PB: predicated region body
PF: predicated region fallthrough
CT: control target
= control target key end

     0   :  { %7 = vsyncpa [#allocation5], 0  ;;  %s260_s0 = inlined_call_operand.hbm [shape: f32[16,128], index: 0, kind: input, shape index: {}]   ;;  %s261_s1 = inlined_call_operand.hbm [shape: f32[16,128], index: 1, kind: input, shape index: {}]   ;;  %s262_s2 = inlined_call_operand.hbm [shape: f32[1,1], index: 2, kind: output, shape index: {}]  }
   0x1   :  { %8 = vsyncpa [#allocation8], 0 }
   0x2   :  { %9 = vsyncpa [#allocation6], 0  ;;  %s204_s9 = smov [#allocation4]   ;;  %s132_s13 = scalar_lea.hbm %s260_s0, 256 }
   0x3   :  { %s15_s10 = sshll.u32 %s204_s9, 4  ;;  %p133_p0 = scmp.ne.s32.totalorder %s260_s0, %s132_s13  ;;  %s16_s10 = int_to_ptr.vmem [resolvable:$true] %s15_s10 }
   0x4   :  { %p136_p1 = scmp.lt.u32.totalorder %s132_s13, %s260_s0 }
   0x6   :  { %p138_p2 = pnand %p136_p1, %p133_p0 }
   0x8   :  { %141 = shalt.err (!%p138_p2)
}
   0x9   :  { %s142_s18 = scalar_lea.vmem %s16_s10, 256  ;;  %p147_p4 = scmp.lt.s32.totalorder %s16_s10, %s16_s10 }
   0xa   :  { %p143_p3 = scmp.ne.s32.totalorder %s16_s10, %s142_s18  ;;  %p148_p5 = scmp.lt.s32.totalorder %s142_s18, %s142_s18 }
   0xc   :  { %p149_p6 = por %p148_p5, %p147_p4 }
   0xe   :  { %p150_p7 = pnand %p149_p6, %p143_p3 }
  0x10   :  { %153 = shalt.err (!%p150_p7)
}
  0x11   :  { %s205_s19 = smov 128   ;;  %s206_s20 = smov 8  }
  0x12   :  { %21 = dma.hbm_to_vmem [thread:$0]  %s260_s0, 256, %s16_s10, [#allocation5], %s205_s19, %s205_s19, %s206_s20  }
  0x13   :  { %s207_s23 = smov [#allocation7]   ;;  %s154_s27 = scalar_lea.hbm %s261_s1, 256 }
  0x14   :  { %s27_s24 = sshll.u32 %s207_s23, 4  ;;  %p155_p8 = scmp.ne.s32.totalorder %s261_s1, %s154_s27  ;;  %s28_s24 = int_to_ptr.vmem [resolvable:$true] %s27_s24 }
  0x15   :  { %p158_p9 = scmp.lt.u32.totalorder %s154_s27, %s261_s1 }
  0x17   :  { %p160_p10 = pnand %p158_p9, %p155_p8 }
  0x19   :  { %163 = shalt.err (!%p160_p10)
}
  0x1a   :  { %s164_s4 = scalar_lea.vmem %s28_s24, 256  ;;  %p169_p12 = scmp.lt.s32.totalorder %s28_s24, %s28_s24 }
  0x1b   :  { %p165_p11 = scmp.ne.s32.totalorder %s28_s24, %s164_s4  ;;  %p170_p13 = scmp.lt.s32.totalorder %s164_s4, %s164_s4 }
  0x1d   :  { %p171_p0 = por %p170_p13, %p169_p12 }
  0x1f   :  { %p172_p1 = pnand %p171_p0, %p165_p11 }
  0x21   :  { %175 = shalt.err (!%p172_p1)
}
  0x22   :  { %33 = dma.hbm_to_vmem [thread:$0]  %s261_s1, 256, %s28_s24, [#allocation8], %s205_s19, %s205_s19, %s206_s20  }
  0x23   :  { %198 = dma.done.wait [#allocation5], 256  }
  0x24   :  { %199 = vsyncadd [#allocation5], 4294967040 }
  0x25   :  { %200 = dma.done.wait [#allocation8], 256  }
  0x26   :  { %201 = vsyncadd [#allocation8], 4294967040  ;;  %v48_v0 = vld [vmem:[#allocation4] sm:$0xff]  ;;  %v49_v1 = vld [vmem:[#allocation4 + $0x8] sm:$0xff]  ;;  %s208_s7 = smov [#allocation9]   ;;  %vm103_vm0 = vcmask 0  }
  0x27   :  { %v50_v2 = vld [vmem:[#allocation7] sm:$0xff]  ;;  %v51_v3 = vld [vmem:[#allocation7 + $0x8] sm:$0xff]  ;;  %s111_s8 = sshll.u32 %s208_s7, 4  ;;  %s112_s8 = int_to_ptr.vmem [resolvable:$true] %s111_s8 }
  0x28   :  { %v54_v4 = vmul.f32 %v50_v2, %v48_v0  ;;  %v55_v5 = vmul.f32 %v51_v3, %v49_v1  ;;  %v62_v6 = vadd.f32 %v50_v2, %v48_v0  ;;  %v63_v7 = vadd.f32 %v51_v3, %v49_v1  ;;  %s176_s9 = scalar_lea.vmem %s112_s8, 16  ;;  %s180_s10 = scalar_lea.vmem %s112_s8, 32 }
  0x29   :  { %p177_p2 = scmp.ne.s32.totalorder %s112_s8, %s176_s9  ;;  %p181_p3 = scmp.lt.s32.totalorder %s112_s8, %s112_s8 }
  0x2a   :  { %v73_v8 = vadd.f32 %v55_v5, %v54_v4  ;;  %v86_v9 = vadd.f32 %v63_v7, %v62_v6  ;;  %p182_p4 = scmp.lt.s32.totalorder %s180_s10, %s176_s9 }
  0x2c   :  { %74 = vadd.xlane.f32.xlu0 %v73_v8  ;;  %p183_p5 = por %p182_p4, %p181_p3 }
  0x2e   :  { %p184_p6 = pnand %p183_p5, %p177_p2 }
  0x30   :  { %87 = vadd.xlane.f32.xlu0 %v86_v9 }
  0xb9   :  { %v75_v10 = vpop.xlane.xlu0 %74 }
  0xba   :  { %v76_v11 = vrot.slane %v75_v10, 4 }
  0xbc   :  { %v77_v12 = vadd.f32 %v76_v11, %v75_v10 }
  0xbd   :  { %v88_v13 = vpop.xlane.xlu0 %87 }
  0xbe   :  { %v78_v14 = vrot.slane %v77_v12, 2  ;;  %v89_v15 = vrot.slane %v88_v13, 4 }
  0xc0   :  { %v90_v16 = vadd.f32 %v89_v15, %v88_v13  ;;  %v79_v17 = vadd.f32 %v78_v14, %v77_v12 }
  0xc2   :  { %v91_v18 = vrot.slane %v90_v16, 2  ;;  %v80_v19 = vrot.slane %v79_v17, 1 }
  0xc4   :  { %v92_v20 = vadd.f32 %v91_v18, %v90_v16  ;;  %v81_v21 = vadd.f32 %v80_v19, %v79_v17 }
  0xc6   :  { %121 = vpush %v81_v21  ;;  %v93_v22 = vrot.slane %v92_v20, 1 }
  0xc8   :  { %v94_v23 = vadd.f32 %v93_v22, %v92_v20 }
  0xca   :  { %123 = vpush %v94_v23 }
  0xf7   :  { %s122_s1 = spop %121 }
  0xf8   :  { %v83_v26 = vstv %s122_s1 }
  0xf9   :  { %v97_v27 = vmul.f32 2.0, %v83_v26 }
  0xfb   :  { %s124_s6 = spop %123  ;;  %v98_v28 = vadd.f32 1e-06, %v97_v27 }
  0xfc   :  { %v96_v24 = vstv %s124_s6 }
  0xfd   :  { %v99_v25 = vadd.f32 1e-06, %v96_v24 }
  0xff   :  { %130 = vrcp.f32 %v99_v25 }
 0x109   :  { %v131_v29 = vpop.eup %130 }
 0x10a   :  { %v101_v30 = vmul.f32 %v131_v29, %v98_v28 }
 0x10c   :  { %v102_v31 = vsub.f32 1.0, %v101_v30 }
 0x10e   :  { %104 = vst.msk [vmem:[#allocation9] sm:$0x1] %vm103_vm0, %v102_v31 }
 0x10f   :  { %187 = shalt.err (!%p184_p6)
}
 0x110   :  { %s188_s13 = scalar_lea.hbm %s262_s2, 16 }
 0x111   :  { %p189_p7 = scmp.ne.s32.totalorder %s262_s2, %s188_s13  ;;  %p192_p8 = scmp.lt.u32.totalorder %s188_s13, %s262_s2 }
 0x113   :  { %p194_p9 = pnand %p192_p8, %p189_p7 }
 0x115   :  { %197 = shalt.err (!%p194_p9)
}
 0x116   :  { %114 = dma.vmem_to_hbm [thread:$0]  %s112_s8, 16, %s262_s2, [#allocation6]  }
 0x117   :  { %202 = dma.done.wait [#allocation6], 16  }
 0x118   :  { %203 = vsyncadd [#allocation6], 4294967280 }
 0x119   :  { %118 = vsyncpa [#allocation5], 1 }
 0x11a   :  { %119 = vsyncpa [#allocation8], 1 }
 0x11b   :  { %120 = vsyncpa [#allocation6], 1 }

</bundles_post_ra>
